<compile_context>
chip_gen: v5e
topology: v5e:2x2
jax: 0.10.0
libtpu: 0.0.40
codegen_flags: <defaults>
</compile_context>

<pallas_src>
import numpy as np
import jax
import jax.numpy as jnp
from jax.experimental import pallas as pl
from jax.experimental.pallas import tpu as pltpu


# ---------------------------------------------------------------------------
# Kernels
# ---------------------------------------------------------------------------

def _mixup_images_kernel(idx_ref, lam_ref, img_hbm_ref, img_blk_ref,
                         out_ref, gather_buf, sem):
    """Blend `block_rows` image rows: out = lam * x + (1-lam) * x[index].

    idx_ref, lam_ref : SMEM (scalar prefetch) -- permutation and lambda.
    img_hbm_ref      : raw HBM ref (B, D), used only as a DMA gather source.
    img_blk_ref      : VMEM block (block_rows, D), the un-permuted rows.
    out_ref          : VMEM block (block_rows, D).
    gather_buf       : VMEM scratch (block_rows, D) for the gathered rows.
    sem              : DMA semaphores, one per gathered row.
    """
    i = pl.program_id(0)
    tb = gather_buf.shape[0]
    row0 = i * tb

    # Gather the permuted rows for this tile from HBM into VMEM scratch.
    copies = []
    for j in range(tb):  # tb is a static Python int -> unrolled
        src_row = idx_ref[row0 + j]
        cp = pltpu.make_async_copy(img_hbm_ref.at[src_row],
                                   gather_buf.at[j],
                                   sem.at[j])
        cp.start()
        copies.append(cp)
    for cp in copies:
        cp.wait()

    lam = lam_ref[0]
    out_ref[...] = (lam * img_blk_ref[...]
                    + (1.0 - lam) * gather_buf[...]).astype(out_ref.dtype)


def _mixup_labels_kernel(lam_ref, lbl_ref, lbl_perm_ref, out_ref):
    """Single-step full-array label blend (labels are tiny)."""
    lam = lam_ref[0]
    out_ref[...] = (lam * lbl_ref[...]
                    + (1.0 - lam) * lbl_perm_ref[...]).astype(out_ref.dtype)


# ---------------------------------------------------------------------------
# Wrapper
# ---------------------------------------------------------------------------

def _pick_block_rows(batch, row_bytes, target_bytes=1 << 19):
    """Rows per grid step: aim for ~512 KiB per stream per step, keep the
    sublane (second-to-last) block dim a multiple of 8 (or 1, or the full
    batch) per the (8,128) tiling rule, and make it divide the batch."""
    want = int(max(1, target_bytes // max(row_bytes, 1)))
    if want >= batch:
        return batch
    best = 1
    for tb in range(1, want + 1):
        if batch % tb == 0 and (tb % 8 == 0 or tb == 1):
            best = tb
    return best


def sample_mixup_lam(alpha, is_mixmatch=False, rng=None):
    """Host-side lambda sampling, matching the PyTorch module."""
    rng = np.random.default_rng(0) if rng is None else rng
    lam = float(rng.beta(alpha, alpha)) if alpha > 0 else 1.0
    if is_mixmatch:
        lam = max(lam, 1.0 - lam)
    return lam


def mixup_pallas(images, labels, lam, index, block_rows=None):
    """images: (B, C, H, W), labels: (B, NC), lam: python float,
    index: (B,) int32 permutation.
    Returns (mixed_images, mixed_labels, lam, index)."""
    B = images.shape[0]
    D = int(np.prod(images.shape[1:]))
    NC = labels.shape[-1]

    images_flat = images.reshape(B, D)          # free bitcast-style reshape
    lam_arr = jnp.asarray([lam], dtype=jnp.float32)
    index = jnp.asarray(index, dtype=jnp.int32)

    row_bytes = D * images.dtype.itemsize
    if block_rows is None:
        block_rows = _pick_block_rows(B, row_bytes)
    tb = int(block_rows)
    if B % tb != 0:
        raise ValueError(f"block_rows={tb} must divide batch={B}")

    # ---- images: multi-row lane-dense blend with in-kernel DMA gather ------
    # VMEM use per core: 2x double-buffered (in + out) + 1x gather scratch
    # ~= 5 * tb * D * itemsize; block_rows is sized to stay well under the
    # default scoped VMEM limit on all of v5e/v6e/v7x.
    grid = (B // tb,)
    img_grid_spec = pltpu.PrefetchScalarGridSpec(
        num_scalar_prefetch=2,                      # (index, lam) -> SMEM
        grid=grid,
        in_specs=[
            pl.BlockSpec(memory_space=pl.ANY),                    # gather src
            pl.BlockSpec((tb, D), lambda i, idx, lam: (i, 0)),    # original
        ],
        out_specs=pl.BlockSpec((tb, D), lambda i, idx, lam: (i, 0)),
        scratch_shapes=[
            pltpu.VMEM((tb, D), images.dtype),
            pltpu.SemaphoreType.DMA((tb,)),
        ],
    )
    mixed_flat = pl.pallas_call(
        _mixup_images_kernel,
        grid_spec=img_grid_spec,
        out_shape=jax.ShapeDtypeStruct((B, D), images.dtype),
        compiler_params=pltpu.CompilerParams(
            # No cross-step state -> batch axis can be sharded across both
            # TensorCores on v7x; harmless no-op on single-TC v5e/v6e.
            dimension_semantics=("parallel",)),
    )(index, lam_arr, images_flat, images_flat)
    mixed_images = mixed_flat.reshape(images.shape)

    # ---- labels: one tiny full-array blend (kept off the per-image grid) ---
    labels_perm = jnp.take(labels, index, axis=0)   # negligible gather
    lbl_grid_spec = pltpu.PrefetchScalarGridSpec(
        num_scalar_prefetch=1,                      # lam -> SMEM
        grid=(1,),
        in_specs=[pl.BlockSpec((B, NC), lambda i, lam: (0, 0)),
                  pl.BlockSpec((B, NC), lambda i, lam: (0, 0))],
        out_specs=pl.BlockSpec((B, NC), lambda i, lam: (0, 0)),
    )
    mixed_labels = pl.pallas_call(
        _mixup_labels_kernel,
        grid_spec=lbl_grid_spec,
        out_shape=jax.ShapeDtypeStruct((B, NC), labels.dtype),
    )(lam_arr, labels, labels_perm)

    return mixed_images, mixed_labels, lam, index


# ---------------------------------------------------------------------------
# Demo / correctness check
# ---------------------------------------------------------------------------

if __name__ == "__main__":
    B, C, H, W = 16, 4, 16, 16          # D = C*H*W = 1024 (lane-dense, 8*128)
    NUM_CLASSES = 10
    ALPHA = 1.0
    IS_MIXMATCH = False

    key = jax.random.PRNGKey(0)
    k_img, k_lbl, k_perm = jax.random.split(key, 3)

    images = jax.random.normal(k_img, (B, C, H, W), dtype=jnp.float32)
    label_ids = jax.random.randint(k_lbl, (B,), 0, NUM_CLASSES)
    labels = jax.nn.one_hot(label_ids, NUM_CLASSES, dtype=jnp.float32)

    # lam ~ Beta(alpha, alpha) sampled host-side (as in the PyTorch module),
    # deterministic via fixed numpy seed.
    lam = sample_mixup_lam(ALPHA, IS_MIXMATCH, np.random.default_rng(0))
    index = jax.random.permutation(k_perm, B).astype(jnp.int32)

    # block_rows=8 -> 2 grid steps of (8, 1024) tiles (exercises multi-step).
    mixed_images, mixed_labels, lam_out, index_out = mixup_pallas(
        images, labels, lam, index, block_rows=8)
    jax.block_until_ready((mixed_images, mixed_labels))

    # Reference check in plain JAX.
    ref_images = lam * images + (1.0 - lam) * images[index]
    ref_labels = lam * labels + (1.0 - lam) * labels[index]
    assert jnp.allclose(mixed_images, ref_images, atol=1e-6)
    assert jnp.allclose(mixed_labels, ref_labels, atol=1e-6)

    print("KERNEL_OK")
</pallas_src>

<mosaic_0001>
module attributes {stable_mosaic.version = 11 : i64} {
  func.func @_mixup_images_kernel(%arg0: i32, %arg1: memref<16xi32, #tpu.memory_space<smem>>, %arg2: memref<1xf32, #tpu.memory_space<smem>>, %arg3: memref<16x1024xf32, #tpu.memory_space<any>>, %arg4: memref<8x1024xf32, #tpu.memory_space<vmem>>, %arg5: memref<8x1024xf32, #tpu.memory_space<vmem>>, %arg6: memref<8x1024xf32, #tpu.memory_space<vmem>>, %arg7: memref<8x!tpu.dma_semaphore, #tpu.memory_space<semaphore_mem>>) attributes {dimension_semantics = [#tpu.dimension_semantics<parallel>], iteration_bounds = array<i64: 2>, scalar_prefetch = 2 : i64, scratch_operands = 2 : i64, tpu.core_type = #tpu.core_type<tc>, window_params = [{}, {transform_indices = @transform_1, window_bounds = array<i64: 8, 1024>}, {transform_indices = @transform_2, window_bounds = array<i64: 8, 1024>}]} {
    %c8_i32 = arith.constant 8 : i32
    %0 = arith.muli %arg0, %c8_i32 : i32
    %c0_i32 = arith.constant 0 : i32
    %1 = arith.addi %0, %c0_i32 : i32
    %2 = arith.index_cast %1 : i32 to index
    %3 = memref.load %arg1[%2] : memref<16xi32, #tpu.memory_space<smem>>
    %c0_i32_0 = arith.constant 0 : i32
    %c0_i32_1 = arith.constant 0 : i32
    %c0_i32_2 = arith.constant 0 : i32
    %4 = tpu.memref_slice %arg3[%3, %c0_i32_2] : memref<16x1024xf32, #tpu.memory_space<any>> -> memref<1x1024xf32, #tpu.memory_space<any>>
    %5 = tpu.memref_squeeze %4 : memref<1x1024xf32, #tpu.memory_space<any>> -> memref<1024xf32, #tpu.memory_space<any>>
    %c0_i32_3 = arith.constant 0 : i32
    %6 = tpu.memref_slice %arg6[%c0_i32_0, %c0_i32_3] : memref<8x1024xf32, #tpu.memory_space<vmem>> -> memref<1x1024xf32, #tpu.memory_space<vmem>>
    %7 = tpu.memref_squeeze %6 : memref<1x1024xf32, #tpu.memory_space<vmem>> -> memref<1024xf32, #tpu.memory_space<vmem>>
    %8 = tpu.memref_slice %arg7[%c0_i32_1] : memref<8x!tpu.dma_semaphore, #tpu.memory_space<semaphore_mem>> -> memref<1x!tpu.dma_semaphore, #tpu.memory_space<semaphore_mem>>
    %9 = tpu.memref_squeeze %8 : memref<1x!tpu.dma_semaphore, #tpu.memory_space<semaphore_mem>> -> memref<!tpu.dma_semaphore, #tpu.memory_space<semaphore_mem>>
    tpu.enqueue_dma source(%5 : memref<1024xf32, #tpu.memory_space<any>>) target(%7 : memref<1024xf32, #tpu.memory_space<vmem>>) target_semaphore(%9 : memref<!tpu.dma_semaphore, #tpu.memory_space<semaphore_mem>>)
    %c1_i32 = arith.constant 1 : i32
    %10 = arith.addi %0, %c1_i32 : i32
    %11 = arith.index_cast %10 : i32 to index
    %12 = memref.load %arg1[%11] : memref<16xi32, #tpu.memory_space<smem>>
    %c1_i32_4 = arith.constant 1 : i32
    %c1_i32_5 = arith.constant 1 : i32
    %c0_i32_6 = arith.constant 0 : i32
    %13 = tpu.memref_slice %arg3[%12, %c0_i32_6] : memref<16x1024xf32, #tpu.memory_space<any>> -> memref<1x1024xf32, #tpu.memory_space<any>>
    %14 = tpu.memref_squeeze %13 : memref<1x1024xf32, #tpu.memory_space<any>> -> memref<1024xf32, #tpu.memory_space<any>>
    %c0_i32_7 = arith.constant 0 : i32
    %15 = tpu.memref_slice %arg6[%c1_i32_4, %c0_i32_7] : memref<8x1024xf32, #tpu.memory_space<vmem>> -> memref<1x1024xf32, #tpu.memory_space<vmem>>
    %16 = tpu.memref_squeeze %15 : memref<1x1024xf32, #tpu.memory_space<vmem>> -> memref<1024xf32, #tpu.memory_space<vmem>>
    %17 = tpu.memref_slice %arg7[%c1_i32_5] : memref<8x!tpu.dma_semaphore, #tpu.memory_space<semaphore_mem>> -> memref<1x!tpu.dma_semaphore, #tpu.memory_space<semaphore_mem>>
    %18 = tpu.memref_squeeze %17 : memref<1x!tpu.dma_semaphore, #tpu.memory_space<semaphore_mem>> -> memref<!tpu.dma_semaphore, #tpu.memory_space<semaphore_mem>>
    tpu.enqueue_dma source(%14 : memref<1024xf32, #tpu.memory_space<any>>) target(%16 : memref<1024xf32, #tpu.memory_space<vmem>>) target_semaphore(%18 : memref<!tpu.dma_semaphore, #tpu.memory_space<semaphore_mem>>)
    %c2_i32 = arith.constant 2 : i32
    %19 = arith.addi %0, %c2_i32 : i32
    %20 = arith.index_cast %19 : i32 to index
    %21 = memref.load %arg1[%20] : memref<16xi32, #tpu.memory_space<smem>>
    %c2_i32_8 = arith.constant 2 : i32
    %c2_i32_9 = arith.constant 2 : i32
    %c0_i32_10 = arith.constant 0 : i32
    %22 = tpu.memref_slice %arg3[%21, %c0_i32_10] : memref<16x1024xf32, #tpu.memory_space<any>> -> memref<1x1024xf32, #tpu.memory_space<any>>
    %23 = tpu.memref_squeeze %22 : memref<1x1024xf32, #tpu.memory_space<any>> -> memref<1024xf32, #tpu.memory_space<any>>
    %c0_i32_11 = arith.constant 0 : i32
    %24 = tpu.memref_slice %arg6[%c2_i32_8, %c0_i32_11] : memref<8x1024xf32, #tpu.memory_space<vmem>> -> memref<1x1024xf32, #tpu.memory_space<vmem>>
    %25 = tpu.memref_squeeze %24 : memref<1x1024xf32, #tpu.memory_space<vmem>> -> memref<1024xf32, #tpu.memory_space<vmem>>
    %26 = tpu.memref_slice %arg7[%c2_i32_9] : memref<8x!tpu.dma_semaphore, #tpu.memory_space<semaphore_mem>> -> memref<1x!tpu.dma_semaphore, #tpu.memory_space<semaphore_mem>>
    %27 = tpu.memref_squeeze %26 : memref<1x!tpu.dma_semaphore, #tpu.memory_space<semaphore_mem>> -> memref<!tpu.dma_semaphore, #tpu.memory_space<semaphore_mem>>
    tpu.enqueue_dma source(%23 : memref<1024xf32, #tpu.memory_space<any>>) target(%25 : memref<1024xf32, #tpu.memory_space<vmem>>) target_semaphore(%27 : memref<!tpu.dma_semaphore, #tpu.memory_space<semaphore_mem>>)
    %c3_i32 = arith.constant 3 : i32
    %28 = arith.addi %0, %c3_i32 : i32
    %29 = arith.index_cast %28 : i32 to index
    %30 = memref.load %arg1[%29] : memref<16xi32, #tpu.memory_space<smem>>
    %c3_i32_12 = arith.constant 3 : i32
    %c3_i32_13 = arith.constant 3 : i32
    %c0_i32_14 = arith.constant 0 : i32
    %31 = tpu.memref_slice %arg3[%30, %c0_i32_14] : memref<16x1024xf32, #tpu.memory_space<any>> -> memref<1x1024xf32, #tpu.memory_space<any>>
    %32 = tpu.memref_squeeze %31 : memref<1x1024xf32, #tpu.memory_space<any>> -> memref<1024xf32, #tpu.memory_space<any>>
    %c0_i32_15 = arith.constant 0 : i32
    %33 = tpu.memref_slice %arg6[%c3_i32_12, %c0_i32_15] : memref<8x1024xf32, #tpu.memory_space<vmem>> -> memref<1x1024xf32, #tpu.memory_space<vmem>>
    %34 = tpu.memref_squeeze %33 : memref<1x1024xf32, #tpu.memory_space<vmem>> -> memref<1024xf32, #tpu.memory_space<vmem>>
    %35 = tpu.memref_slice %arg7[%c3_i32_13] : memref<8x!tpu.dma_semaphore, #tpu.memory_space<semaphore_mem>> -> memref<1x!tpu.dma_semaphore, #tpu.memory_space<semaphore_mem>>
    %36 = tpu.memref_squeeze %35 : memref<1x!tpu.dma_semaphore, #tpu.memory_space<semaphore_mem>> -> memref<!tpu.dma_semaphore, #tpu.memory_space<semaphore_mem>>
    tpu.enqueue_dma source(%32 : memref<1024xf32, #tpu.memory_space<any>>) target(%34 : memref<1024xf32, #tpu.memory_space<vmem>>) target_semaphore(%36 : memref<!tpu.dma_semaphore, #tpu.memory_space<semaphore_mem>>)
    %c4_i32 = arith.constant 4 : i32
    %37 = arith.addi %0, %c4_i32 : i32
    %38 = arith.index_cast %37 : i32 to index
    %39 = memref.load %arg1[%38] : memref<16xi32, #tpu.memory_space<smem>>
    %c4_i32_16 = arith.constant 4 : i32
    %c4_i32_17 = arith.constant 4 : i32
    %c0_i32_18 = arith.constant 0 : i32
    %40 = tpu.memref_slice %arg3[%39, %c0_i32_18] : memref<16x1024xf32, #tpu.memory_space<any>> -> memref<1x1024xf32, #tpu.memory_space<any>>
    %41 = tpu.memref_squeeze %40 : memref<1x1024xf32, #tpu.memory_space<any>> -> memref<1024xf32, #tpu.memory_space<any>>
    %c0_i32_19 = arith.constant 0 : i32
    %42 = tpu.memref_slice %arg6[%c4_i32_16, %c0_i32_19] : memref<8x1024xf32, #tpu.memory_space<vmem>> -> memref<1x1024xf32, #tpu.memory_space<vmem>>
    %43 = tpu.memref_squeeze %42 : memref<1x1024xf32, #tpu.memory_space<vmem>> -> memref<1024xf32, #tpu.memory_space<vmem>>
    %44 = tpu.memref_slice %arg7[%c4_i32_17] : memref<8x!tpu.dma_semaphore, #tpu.memory_space<semaphore_mem>> -> memref<1x!tpu.dma_semaphore, #tpu.memory_space<semaphore_mem>>
    %45 = tpu.memref_squeeze %44 : memref<1x!tpu.dma_semaphore, #tpu.memory_space<semaphore_mem>> -> memref<!tpu.dma_semaphore, #tpu.memory_space<semaphore_mem>>
    tpu.enqueue_dma source(%41 : memref<1024xf32, #tpu.memory_space<any>>) target(%43 : memref<1024xf32, #tpu.memory_space<vmem>>) target_semaphore(%45 : memref<!tpu.dma_semaphore, #tpu.memory_space<semaphore_mem>>)
    %c5_i32 = arith.constant 5 : i32
    %46 = arith.addi %0, %c5_i32 : i32
    %47 = arith.index_cast %46 : i32 to index
    %48 = memref.load %arg1[%47] : memref<16xi32, #tpu.memory_space<smem>>
    %c5_i32_20 = arith.constant 5 : i32
    %c5_i32_21 = arith.constant 5 : i32
    %c0_i32_22 = arith.constant 0 : i32
    %49 = tpu.memref_slice %arg3[%48, %c0_i32_22] : memref<16x1024xf32, #tpu.memory_space<any>> -> memref<1x1024xf32, #tpu.memory_space<any>>
    %50 = tpu.memref_squeeze %49 : memref<1x1024xf32, #tpu.memory_space<any>> -> memref<1024xf32, #tpu.memory_space<any>>
    %c0_i32_23 = arith.constant 0 : i32
    %51 = tpu.memref_slice %arg6[%c5_i32_20, %c0_i32_23] : memref<8x1024xf32, #tpu.memory_space<vmem>> -> memref<1x1024xf32, #tpu.memory_space<vmem>>
    %52 = tpu.memref_squeeze %51 : memref<1x1024xf32, #tpu.memory_space<vmem>> -> memref<1024xf32, #tpu.memory_space<vmem>>
    %53 = tpu.memref_slice %arg7[%c5_i32_21] : memref<8x!tpu.dma_semaphore, #tpu.memory_space<semaphore_mem>> -> memref<1x!tpu.dma_semaphore, #tpu.memory_space<semaphore_mem>>
    %54 = tpu.memref_squeeze %53 : memref<1x!tpu.dma_semaphore, #tpu.memory_space<semaphore_mem>> -> memref<!tpu.dma_semaphore, #tpu.memory_space<semaphore_mem>>
    tpu.enqueue_dma source(%50 : memref<1024xf32, #tpu.memory_space<any>>) target(%52 : memref<1024xf32, #tpu.memory_space<vmem>>) target_semaphore(%54 : memref<!tpu.dma_semaphore, #tpu.memory_space<semaphore_mem>>)
    %c6_i32 = arith.constant 6 : i32
    %55 = arith.addi %0, %c6_i32 : i32
    %56 = arith.index_cast %55 : i32 to index
    %57 = memref.load %arg1[%56] : memref<16xi32, #tpu.memory_space<smem>>
    %c6_i32_24 = arith.constant 6 : i32
    %c6_i32_25 = arith.constant 6 : i32
    %c0_i32_26 = arith.constant 0 : i32
    %58 = tpu.memref_slice %arg3[%57, %c0_i32_26] : memref<16x1024xf32, #tpu.memory_space<any>> -> memref<1x1024xf32, #tpu.memory_space<any>>
    %59 = tpu.memref_squeeze %58 : memref<1x1024xf32, #tpu.memory_space<any>> -> memref<1024xf32, #tpu.memory_space<any>>
    %c0_i32_27 = arith.constant 0 : i32
    %60 = tpu.memref_slice %arg6[%c6_i32_24, %c0_i32_27] : memref<8x1024xf32, #tpu.memory_space<vmem>> -> memref<1x1024xf32, #tpu.memory_space<vmem>>
    %61 = tpu.memref_squeeze %60 : memref<1x1024xf32, #tpu.memory_space<vmem>> -> memref<1024xf32, #tpu.memory_space<vmem>>
    %62 = tpu.memref_slice %arg7[%c6_i32_25] : memref<8x!tpu.dma_semaphore, #tpu.memory_space<semaphore_mem>> -> memref<1x!tpu.dma_semaphore, #tpu.memory_space<semaphore_mem>>
    %63 = tpu.memref_squeeze %62 : memref<1x!tpu.dma_semaphore, #tpu.memory_space<semaphore_mem>> -> memref<!tpu.dma_semaphore, #tpu.memory_space<semaphore_mem>>
    tpu.enqueue_dma source(%59 : memref<1024xf32, #tpu.memory_space<any>>) target(%61 : memref<1024xf32, #tpu.memory_space<vmem>>) target_semaphore(%63 : memref<!tpu.dma_semaphore, #tpu.memory_space<semaphore_mem>>)
    %c7_i32 = arith.constant 7 : i32
    %64 = arith.addi %0, %c7_i32 : i32
    %65 = arith.index_cast %64 : i32 to index
    %66 = memref.load %arg1[%65] : memref<16xi32, #tpu.memory_space<smem>>
    %c7_i32_28 = arith.constant 7 : i32
    %c7_i32_29 = arith.constant 7 : i32
    %c0_i32_30 = arith.constant 0 : i32
    %67 = tpu.memref_slice %arg3[%66, %c0_i32_30] : memref<16x1024xf32, #tpu.memory_space<any>> -> memref<1x1024xf32, #tpu.memory_space<any>>
    %68 = tpu.memref_squeeze %67 : memref<1x1024xf32, #tpu.memory_space<any>> -> memref<1024xf32, #tpu.memory_space<any>>
    %c0_i32_31 = arith.constant 0 : i32
    %69 = tpu.memref_slice %arg6[%c7_i32_28, %c0_i32_31] : memref<8x1024xf32, #tpu.memory_space<vmem>> -> memref<1x1024xf32, #tpu.memory_space<vmem>>
    %70 = tpu.memref_squeeze %69 : memref<1x1024xf32, #tpu.memory_space<vmem>> -> memref<1024xf32, #tpu.memory_space<vmem>>
    %71 = tpu.memref_slice %arg7[%c7_i32_29] : memref<8x!tpu.dma_semaphore, #tpu.memory_space<semaphore_mem>> -> memref<1x!tpu.dma_semaphore, #tpu.memory_space<semaphore_mem>>
    %72 = tpu.memref_squeeze %71 : memref<1x!tpu.dma_semaphore, #tpu.memory_space<semaphore_mem>> -> memref<!tpu.dma_semaphore, #tpu.memory_space<semaphore_mem>>
    tpu.enqueue_dma source(%68 : memref<1024xf32, #tpu.memory_space<any>>) target(%70 : memref<1024xf32, #tpu.memory_space<vmem>>) target_semaphore(%72 : memref<!tpu.dma_semaphore, #tpu.memory_space<semaphore_mem>>)
    %c0_i32_32 = arith.constant 0 : i32
    %c0_i32_33 = arith.constant 0 : i32
    %c0_i32_34 = arith.constant 0 : i32
    %73 = tpu.memref_slice %arg3[%3, %c0_i32_34] : memref<16x1024xf32, #tpu.memory_space<any>> -> memref<1x1024xf32, #tpu.memory_space<any>>
    %74 = tpu.memref_squeeze %73 : memref<1x1024xf32, #tpu.memory_space<any>> -> memref<1024xf32, #tpu.memory_space<any>>
    %c0_i32_35 = arith.constant 0 : i32
    %75 = tpu.memref_slice %arg6[%c0_i32_32, %c0_i32_35] : memref<8x1024xf32, #tpu.memory_space<vmem>> -> memref<1x1024xf32, #tpu.memory_space<vmem>>
    %76 = tpu.memref_squeeze %75 : memref<1x1024xf32, #tpu.memory_space<vmem>> -> memref<1024xf32, #tpu.memory_space<vmem>>
    %77 = tpu.memref_slice %arg7[%c0_i32_33] : memref<8x!tpu.dma_semaphore, #tpu.memory_space<semaphore_mem>> -> memref<1x!tpu.dma_semaphore, #tpu.memory_space<semaphore_mem>>
    %78 = tpu.memref_squeeze %77 : memref<1x!tpu.dma_semaphore, #tpu.memory_space<semaphore_mem>> -> memref<!tpu.dma_semaphore, #tpu.memory_space<semaphore_mem>>
    tpu.wait_dma2 semaphore(%78 : memref<!tpu.dma_semaphore, #tpu.memory_space<semaphore_mem>>) src(%74 : memref<1024xf32, #tpu.memory_space<any>>) dst(%76 : memref<1024xf32, #tpu.memory_space<vmem>>)
    %c1_i32_36 = arith.constant 1 : i32
    %c1_i32_37 = arith.constant 1 : i32
    %c0_i32_38 = arith.constant 0 : i32
    %79 = tpu.memref_slice %arg3[%12, %c0_i32_38] : memref<16x1024xf32, #tpu.memory_space<any>> -> memref<1x1024xf32, #tpu.memory_space<any>>
    %80 = tpu.memref_squeeze %79 : memref<1x1024xf32, #tpu.memory_space<any>> -> memref<1024xf32, #tpu.memory_space<any>>
    %c0_i32_39 = arith.constant 0 : i32
    %81 = tpu.memref_slice %arg6[%c1_i32_36, %c0_i32_39] : memref<8x1024xf32, #tpu.memory_space<vmem>> -> memref<1x1024xf32, #tpu.memory_space<vmem>>
    %82 = tpu.memref_squeeze %81 : memref<1x1024xf32, #tpu.memory_space<vmem>> -> memref<1024xf32, #tpu.memory_space<vmem>>
    %83 = tpu.memref_slice %arg7[%c1_i32_37] : memref<8x!tpu.dma_semaphore, #tpu.memory_space<semaphore_mem>> -> memref<1x!tpu.dma_semaphore, #tpu.memory_space<semaphore_mem>>
    %84 = tpu.memref_squeeze %83 : memref<1x!tpu.dma_semaphore, #tpu.memory_space<semaphore_mem>> -> memref<!tpu.dma_semaphore, #tpu.memory_space<semaphore_mem>>
    tpu.wait_dma2 semaphore(%84 : memref<!tpu.dma_semaphore, #tpu.memory_space<semaphore_mem>>) src(%80 : memref<1024xf32, #tpu.memory_space<any>>) dst(%82 : memref<1024xf32, #tpu.memory_space<vmem>>)
    %c2_i32_40 = arith.constant 2 : i32
    %c2_i32_41 = arith.constant 2 : i32
    %c0_i32_42 = arith.constant 0 : i32
    %85 = tpu.memref_slice %arg3[%21, %c0_i32_42] : memref<16x1024xf32, #tpu.memory_space<any>> -> memref<1x1024xf32, #tpu.memory_space<any>>
    %86 = tpu.memref_squeeze %85 : memref<1x1024xf32, #tpu.memory_space<any>> -> memref<1024xf32, #tpu.memory_space<any>>
    %c0_i32_43 = arith.constant 0 : i32
    %87 = tpu.memref_slice %arg6[%c2_i32_40, %c0_i32_43] : memref<8x1024xf32, #tpu.memory_space<vmem>> -> memref<1x1024xf32, #tpu.memory_space<vmem>>
    %88 = tpu.memref_squeeze %87 : memref<1x1024xf32, #tpu.memory_space<vmem>> -> memref<1024xf32, #tpu.memory_space<vmem>>
    %89 = tpu.memref_slice %arg7[%c2_i32_41] : memref<8x!tpu.dma_semaphore, #tpu.memory_space<semaphore_mem>> -> memref<1x!tpu.dma_semaphore, #tpu.memory_space<semaphore_mem>>
    %90 = tpu.memref_squeeze %89 : memref<1x!tpu.dma_semaphore, #tpu.memory_space<semaphore_mem>> -> memref<!tpu.dma_semaphore, #tpu.memory_space<semaphore_mem>>
    tpu.wait_dma2 semaphore(%90 : memref<!tpu.dma_semaphore, #tpu.memory_space<semaphore_mem>>) src(%86 : memref<1024xf32, #tpu.memory_space<any>>) dst(%88 : memref<1024xf32, #tpu.memory_space<vmem>>)
    %c3_i32_44 = arith.constant 3 : i32
    %c3_i32_45 = arith.constant 3 : i32
    %c0_i32_46 = arith.constant 0 : i32
    %91 = tpu.memref_slice %arg3[%30, %c0_i32_46] : memref<16x1024xf32, #tpu.memory_space<any>> -> memref<1x1024xf32, #tpu.memory_space<any>>
    %92 = tpu.memref_squeeze %91 : memref<1x1024xf32, #tpu.memory_space<any>> -> memref<1024xf32, #tpu.memory_space<any>>
    %c0_i32_47 = arith.constant 0 : i32
    %93 = tpu.memref_slice %arg6[%c3_i32_44, %c0_i32_47] : memref<8x1024xf32, #tpu.memory_space<vmem>> -> memref<1x1024xf32, #tpu.memory_space<vmem>>
    %94 = tpu.memref_squeeze %93 : memref<1x1024xf32, #tpu.memory_space<vmem>> -> memref<1024xf32, #tpu.memory_space<vmem>>
    %95 = tpu.memref_slice %arg7[%c3_i32_45] : memref<8x!tpu.dma_semaphore, #tpu.memory_space<semaphore_mem>> -> memref<1x!tpu.dma_semaphore, #tpu.memory_space<semaphore_mem>>
    %96 = tpu.memref_squeeze %95 : memref<1x!tpu.dma_semaphore, #tpu.memory_space<semaphore_mem>> -> memref<!tpu.dma_semaphore, #tpu.memory_space<semaphore_mem>>
    tpu.wait_dma2 semaphore(%96 : memref<!tpu.dma_semaphore, #tpu.memory_space<semaphore_mem>>) src(%92 : memref<1024xf32, #tpu.memory_space<any>>) dst(%94 : memref<1024xf32, #tpu.memory_space<vmem>>)
    %c4_i32_48 = arith.constant 4 : i32
    %c4_i32_49 = arith.constant 4 : i32
    %c0_i32_50 = arith.constant 0 : i32
    %97 = tpu.memref_slice %arg3[%39, %c0_i32_50] : memref<16x1024xf32, #tpu.memory_space<any>> -> memref<1x1024xf32, #tpu.memory_space<any>>
    %98 = tpu.memref_squeeze %97 : memref<1x1024xf32, #tpu.memory_space<any>> -> memref<1024xf32, #tpu.memory_space<any>>
    %c0_i32_51 = arith.constant 0 : i32
    %99 = tpu.memref_slice %arg6[%c4_i32_48, %c0_i32_51] : memref<8x1024xf32, #tpu.memory_space<vmem>> -> memref<1x1024xf32, #tpu.memory_space<vmem>>
    %100 = tpu.memref_squeeze %99 : memref<1x1024xf32, #tpu.memory_space<vmem>> -> memref<1024xf32, #tpu.memory_space<vmem>>
    %101 = tpu.memref_slice %arg7[%c4_i32_49] : memref<8x!tpu.dma_semaphore, #tpu.memory_space<semaphore_mem>> -> memref<1x!tpu.dma_semaphore, #tpu.memory_space<semaphore_mem>>
    %102 = tpu.memref_squeeze %101 : memref<1x!tpu.dma_semaphore, #tpu.memory_space<semaphore_mem>> -> memref<!tpu.dma_semaphore, #tpu.memory_space<semaphore_mem>>
    tpu.wait_dma2 semaphore(%102 : memref<!tpu.dma_semaphore, #tpu.memory_space<semaphore_mem>>) src(%98 : memref<1024xf32, #tpu.memory_space<any>>) dst(%100 : memref<1024xf32, #tpu.memory_space<vmem>>)
    %c5_i32_52 = arith.constant 5 : i32
    %c5_i32_53 = arith.constant 5 : i32
    %c0_i32_54 = arith.constant 0 : i32
    %103 = tpu.memref_slice %arg3[%48, %c0_i32_54] : memref<16x1024xf32, #tpu.memory_space<any>> -> memref<1x1024xf32, #tpu.memory_space<any>>
    %104 = tpu.memref_squeeze %103 : memref<1x1024xf32, #tpu.memory_space<any>> -> memref<1024xf32, #tpu.memory_space<any>>
    %c0_i32_55 = arith.constant 0 : i32
    %105 = tpu.memref_slice %arg6[%c5_i32_52, %c0_i32_55] : memref<8x1024xf32, #tpu.memory_space<vmem>> -> memref<1x1024xf32, #tpu.memory_space<vmem>>
    %106 = tpu.memref_squeeze %105 : memref<1x1024xf32, #tpu.memory_space<vmem>> -> memref<1024xf32, #tpu.memory_space<vmem>>
    %107 = tpu.memref_slice %arg7[%c5_i32_53] : memref<8x!tpu.dma_semaphore, #tpu.memory_space<semaphore_mem>> -> memref<1x!tpu.dma_semaphore, #tpu.memory_space<semaphore_mem>>
    %108 = tpu.memref_squeeze %107 : memref<1x!tpu.dma_semaphore, #tpu.memory_space<semaphore_mem>> -> memref<!tpu.dma_semaphore, #tpu.memory_space<semaphore_mem>>
    tpu.wait_dma2 semaphore(%108 : memref<!tpu.dma_semaphore, #tpu.memory_space<semaphore_mem>>) src(%104 : memref<1024xf32, #tpu.memory_space<any>>) dst(%106 : memref<1024xf32, #tpu.memory_space<vmem>>)
    %c6_i32_56 = arith.constant 6 : i32
    %c6_i32_57 = arith.constant 6 : i32
    %c0_i32_58 = arith.constant 0 : i32
    %109 = tpu.memref_slice %arg3[%57, %c0_i32_58] : memref<16x1024xf32, #tpu.memory_space<any>> -> memref<1x1024xf32, #tpu.memory_space<any>>
    %110 = tpu.memref_squeeze %109 : memref<1x1024xf32, #tpu.memory_space<any>> -> memref<1024xf32, #tpu.memory_space<any>>
    %c0_i32_59 = arith.constant 0 : i32
    %111 = tpu.memref_slice %arg6[%c6_i32_56, %c0_i32_59] : memref<8x1024xf32, #tpu.memory_space<vmem>> -> memref<1x1024xf32, #tpu.memory_space<vmem>>
    %112 = tpu.memref_squeeze %111 : memref<1x1024xf32, #tpu.memory_space<vmem>> -> memref<1024xf32, #tpu.memory_space<vmem>>
    %113 = tpu.memref_slice %arg7[%c6_i32_57] : memref<8x!tpu.dma_semaphore, #tpu.memory_space<semaphore_mem>> -> memref<1x!tpu.dma_semaphore, #tpu.memory_space<semaphore_mem>>
    %114 = tpu.memref_squeeze %113 : memref<1x!tpu.dma_semaphore, #tpu.memory_space<semaphore_mem>> -> memref<!tpu.dma_semaphore, #tpu.memory_space<semaphore_mem>>
    tpu.wait_dma2 semaphore(%114 : memref<!tpu.dma_semaphore, #tpu.memory_space<semaphore_mem>>) src(%110 : memref<1024xf32, #tpu.memory_space<any>>) dst(%112 : memref<1024xf32, #tpu.memory_space<vmem>>)
    %c7_i32_60 = arith.constant 7 : i32
    %c7_i32_61 = arith.constant 7 : i32
    %c0_i32_62 = arith.constant 0 : i32
    %115 = tpu.memref_slice %arg3[%66, %c0_i32_62] : memref<16x1024xf32, #tpu.memory_space<any>> -> memref<1x1024xf32, #tpu.memory_space<any>>
    %116 = tpu.memref_squeeze %115 : memref<1x1024xf32, #tpu.memory_space<any>> -> memref<1024xf32, #tpu.memory_space<any>>
    %c0_i32_63 = arith.constant 0 : i32
    %117 = tpu.memref_slice %arg6[%c7_i32_60, %c0_i32_63] : memref<8x1024xf32, #tpu.memory_space<vmem>> -> memref<1x1024xf32, #tpu.memory_space<vmem>>
    %118 = tpu.memref_squeeze %117 : memref<1x1024xf32, #tpu.memory_space<vmem>> -> memref<1024xf32, #tpu.memory_space<vmem>>
    %119 = tpu.memref_slice %arg7[%c7_i32_61] : memref<8x!tpu.dma_semaphore, #tpu.memory_space<semaphore_mem>> -> memref<1x!tpu.dma_semaphore, #tpu.memory_space<semaphore_mem>>
    %120 = tpu.memref_squeeze %119 : memref<1x!tpu.dma_semaphore, #tpu.memory_space<semaphore_mem>> -> memref<!tpu.dma_semaphore, #tpu.memory_space<semaphore_mem>>
    tpu.wait_dma2 semaphore(%120 : memref<!tpu.dma_semaphore, #tpu.memory_space<semaphore_mem>>) src(%116 : memref<1024xf32, #tpu.memory_space<any>>) dst(%118 : memref<1024xf32, #tpu.memory_space<vmem>>)
    %c0 = arith.constant 0 : index
    %121 = memref.load %arg2[%c0] : memref<1xf32, #tpu.memory_space<smem>>
    %c0_64 = arith.constant 0 : index
    %c0_65 = arith.constant 0 : index
    %122 = vector.load %arg4[%c0_64, %c0_65] : memref<8x1024xf32, #tpu.memory_space<vmem>>, vector<8x1024xf32>
    %123 = vector.broadcast %121 : f32 to vector<8x1024xf32>
    %124 = arith.mulf %123, %122 : vector<8x1024xf32>
    %cst = arith.constant 1.000000e+00 : f32
    %125 = arith.subf %cst, %121 : f32
    %c0_66 = arith.constant 0 : index
    %c0_67 = arith.constant 0 : index
    %126 = vector.load %arg6[%c0_66, %c0_67] : memref<8x1024xf32, #tpu.memory_space<vmem>>, vector<8x1024xf32>
    %127 = vector.broadcast %125 : f32 to vector<8x1024xf32>
    %128 = arith.mulf %127, %126 : vector<8x1024xf32>
    %129 = arith.addf %124, %128 : vector<8x1024xf32>
    %c0_68 = arith.constant 0 : index
    %c0_69 = arith.constant 0 : index
    %130 = vector.load %arg5[%c0_68, %c0_69] : memref<8x1024xf32, #tpu.memory_space<vmem>>, vector<8x1024xf32>
    tpu.vector_store %arg5[%c0_68, %c0_69], %129 {strides = array<i32>} : memref<8x1024xf32, #tpu.memory_space<vmem>>, vector<8x1024xf32>,
    return
  }
  func.func @transform_1(%arg0: i32, %arg1: memref<16xi32, #tpu.memory_space<smem>>, %arg2: memref<1xf32, #tpu.memory_space<smem>>) -> (i32, i32) {
    %c0_i32 = arith.constant 0 : i32
    %c0_i32_0 = arith.constant 0 : i32
    return %arg0, %c0_i32 : i32, i32
  }
  func.func @transform_2(%arg0: i32, %arg1: memref<16xi32, #tpu.memory_space<smem>>, %arg2: memref<1xf32, #tpu.memory_space<smem>>) -> (i32, i32) {
    %c0_i32 = arith.constant 0 : i32
    %c0_i32_0 = arith.constant 0 : i32
    return %arg0, %c0_i32 : i32, i32
  }
}

</mosaic_0001>

<bundles_post_ra>
// kernel: tpu_custom_call.1
= control target key start
LH: loop header
LB: loop body
LE: loop exit
PB: predicated region body
PF: predicated region fallthrough
CT: control target
= control target key end

     0   :  { %s925_s20 = smov [#allocation5]   ;;  %s1256_s0 = inlined_call_operand.vmem [shape: s32[16], index: 0, kind: input, shape index: {}]   ;;  %s1257_s1 = inlined_call_operand.<no memory space> [shape: f32[1], index: 1, kind: input, shape index: {}]   ;;  %s1258_s2 = inlined_call_operand.hbm [shape: f32[16,1024], index: 2, kind: input, shape index: {}]   ;;  %s1259_s3 = inlined_call_operand.hbm [shape: f32[16,1024], index: 3, kind: input, shape index: {}]   ;;  %s1260_s4 = inlined_call_operand.hbm [shape: f32[16,1024], index: 4, kind: output, shape index: {}]  }
   0x1   :  { %1271 = sst [smem:[#allocation39_spill]] %s1259_s3  ;;  %s10_s17 = sshll.u32 %s1256_s0, 4  ;;  %s11_s17 = int_to_ptr.vmem [resolvable:$true] %s10_s17 }
   0x2   :  { %14 = sst [smem:[#allocation6]] %s1257_s1 }
   0x3   :  { %13 = dma.vmem_to_smem %s11_s17, 16, %s925_s20, [#allocation4] }
   0x4   :  { %883 = dma.done.wait [#allocation4], 16 }
   0x5   :  { %884 = vsyncadd [#allocation4], 4294967280 }
   0x6   :  { %17 = sfence }
   0x7   :  { %18 = vsyncpa [#allocation8], 0 }
   0x8   :  { %20 = vsyncpa [#allocation8 + $0x1], 0 }
   0x9   :  { %21 = vsyncpa [#allocation9], 0 }
   0xa   :  { %23 = vsyncpa [#allocation9 + $0x1], 0  ;;  %s967_s21 = smov 0   ;;  %s969_s22 = smov 0  }
   0xb   :  { %s971_s23 = smov 0   ;;  %s973_s0 = smov 0  }
   0xc LB: > { %1272 = sst [smem:[#allocation30_spill]] %s911_s21  ;;  %s988_s1 = sadd.s32 4294967295, %s923_s0   ;;  %s923_s0 = sphi %s973_s0, %s1296_s0   ;;  %s919_s23 = sphi %s971_s23, %s1299_s23   ;;  %s915_s22 = sphi %s969_s22, %s1298_s22   ;;  %s911_s21 = sphi %s967_s21, %s1297_s21  }
   0xd   : > { %1273 = sst [smem:[#allocation31_spill]] %s915_s22  ;;  %s515_s24 = sadd.s32 4294967294, %s923_s0  }
   0xe   : > { %1274 = sst [smem:[#allocation32_spill]] %s919_s23  ;;  %s992_s25 = sadd.s32 1, %s923_s0  }
   0xf   : > { %1275 = sst [smem:[#allocation33_spill]] %s923_s0  ;;  %s36_s26 = sadd.s32 1, %s919_s23 }
  0x10   : > { %1276 = sst [smem:[#allocation34_spill]] %s992_s25  ;;  %s33_s27 = ssub.s32 %s923_s0, %s992_s25 }
  0x11   : > { %p43_p0 = scmp.ne.s32.totalorder %s919_s23, %s915_s22  ;;  %p34_p1 = scmp.eq.s32.totalorder %s33_s27, 0 }
  0x12   : > { %p44_p2 = scmp.eq.s32.totalorder %s923_s0, 0  ;;  %p49_p3 = scmp.ne.s32.totalorder %s915_s22, %s911_s21 }
  0x13   : > { %p50_p4 = scmp.eq.s32.totalorder %s988_s1, 0  ;;  %p73_p7 = scmp.eq.s32.totalorder %s988_s1, 1 }
  0x14   : > { %s1004_s28 = scalar_select %p34_p1, %s919_s23, %s36_s26  }
  0x15   : > { %p1006_p5 = por %p44_p2, %p43_p0  ;;  %p1010_p6 = por %p50_p4, %p49_p3 }
  0x16   : > { %1277 = sst [smem:[#allocation35_spill]] %s1004_s28  ;;  %p79_p8 = scmp.eq.s32.totalorder %s515_s24, 1 }
  0x17   : > { %p560_p10 = scmp.lt.s32.totalorder %s923_s0, 2  ;;  %p1017_p11 = por %p73_p7, %p43_p0 }
  0x18   : > { %p1021_p12 = por %p79_p8, %p49_p3  ;;  %s99_s7 = sand.u32 1, %s919_s23  }
  0x19   : > { %s546_s8 = sshll.u32 %s923_s0, 6  ;;  %s518_s9 = sshll.u32 %s99_s7, 6 }
  0x1a   : > { %s1281_s6 = scalar_select %p1021_p12, 1, 0 }
  0x1b   : > { %s1283_s3 = sld [smem:[#allocation39_spill]]  ;;  %s103_s14 = scalar_lea.vmem [#allocation7], %s518_s9 }
  0x1c   : > { %1282 = sst [smem:[#allocation36_spill]] %s1281_s6  ;;  %s112_s15 = sshll.u32 %s103_s14, 4  ;;  %s113_s15 = int_to_ptr.vmem [resolvable:$true] %s112_s15 }
  0x1d   : > { %p1032_p13 = pnand %p560_p10, %p1006_p5  ;;  %p521_p0 = scmp.ge.s32.totalorder %s923_s0, 1 }
  0x1e   : > { %p117_p1 = scmp.lt.s32.totalorder %s923_s0, 3  ;;  %s100_s17 = scalar_lea.sflag [#allocation8], %s99_s7 }
  0x1f   : > { %p621_p3 = pneg %p1032_p13 }
  0x21   : > { %s108_s12 = scalar_lea.hbm %s1283_s3, %s546_s8  ;;  %s624_s26 = scalar_lea.hbm %s1283_s3, 128 }
  0x22   : > { %s110_s13 = sshll.u32 %s108_s12, 4  ;;  %s111_s13 = int_to_ptr.hbm [resolvable:$true] %s110_s13 }
  0x23   : > { %s617_s18 = sshra.s32 %s111_s13, 4  ;;  %s618_s18 = int_to_ptr.hbm [resolvable:$true] %s617_s18 }
  0x24   : > { %s619_s19 = scalar_lea.hbm %s618_s18, 64  ;;  %p625_p5 = scmp.lt.s32.totalorder %s618_s18, %s1283_s3 }
  0x25   : > { %p620_p2 = scmp.ne.s32.totalorder %s618_s18, %s619_s19  ;;  %p626_p8 = scmp.lt.s32.totalorder %s624_s26, %s619_s19 }
  0x27   : > { %p622_p4 = pnand %p621_p3, %p620_p2  ;;  %p627_p10 = por %p626_p8, %p625_p5 }
  0x29   : > { %p623_p7 = pneg %p622_p4 }
  0x2b   : > { %p628_p9 = pnand %p627_p10, %p623_p7 }
  0x2d   : > { %631 = shalt.err (!%p628_p9)
}
  0x2e   : > { %555 = dma.hbm_to_vmem [thread:$0]  (!%p1032_p13), %s111_s13, 1024, %s113_s15, %s100_s17  }
  0x2f   : > { %p118_p2 = pnand %p521_p0, %p117_p1 }
  0x31   : > { %121 = sbr.rel (%p118_p2) target bundleno = 225 (0xe1), region = 24 }
  0x36   : > { %s1053_s7 = sand.u32 1, %s915_s22  }
  0x37   : > { %s1261_s8 = sshll.u32 %s1053_s7, 6  ;;  %s124_s9 = scalar_lea.sflag [#allocation8], %s1053_s7 }
  0x38   : > { %s1059_s10 = scalar_lea.vmem [#allocation7], %s1261_s8 }
  0x39   : > { %886 = dma.done.wait (%p1010_p6), %s124_s9, 1024  }
  0x3a   : > { %888 = vsyncadd (%p1010_p6), %s124_s9, 4294966272  ;;  %s1066_s11 = sshll.u32 %s988_s1, 3  ;;  %s926_s13 = smov [#allocation2]  }
  0x3b   : > { %s148_s12 = sld [smem:[#allocation5 + %s1066_s11]]  ;;  %s1069_s14 = sshll.u32 %s926_s13, 4 }
  0x3c   : > { %1285 = sst [smem:[#allocation37_spill]] %s1069_s14  ;;  %s162_s15 = sadd.s32 1, %s1066_s11 }
  0x3d   : > { %s1073_s16 = sld [smem:[#allocation5 + %s162_s15]]  ;;  %s927_s17 = smov [#allocation2 + $0x1]  }
  0x3e   : > { %s1075_s30 = sshll.u32 %s927_s17, 4  ;;  %s179_s18 = sadd.s32 2, %s1066_s11 }
  0x3f   : > { %1286 = sst [smem:[#allocation38_spill]] %s1075_s30  ;;  %s928_s15 = smov [#allocation2 + $0x2]  }
  0x40   : > { %s1079_s26 = sld [smem:[#allocation5 + %s179_s18]]  ;;  %s1084_s8 = sshll.u32 %s928_s15, 4  ;;  %s191_s8 = int_to_ptr.vmem [resolvable:$true] %s1084_s8 }
  0x41   : > { %s149_s19 = sshrl.u32 %s148_s12, 3  ;;  %s150_s20 = sand.u32 7, %s148_s12  }
  0x42   : > { %s525_s24 = sshll.u32 %s149_s19, 6  ;;  %s1091_s18 = scalar_lea.hbm %s1258_s2, 128 }
  0x43   : > { %s152_s27 = sadd.s32 %s525_s24, %s150_s20  ;;  %s164_s3 = sshrl.u32 %s1073_s16, 3 }
  0x44   : > { %s153_s13 = scalar_lea.hbm %s1258_s2, %s152_s27  ;;  %s165_s17 = sand.u32 7, %s1073_s16  }
  0x45   : > { %s154_s14 = sshll.u32 %s153_s13, 4  ;;  %s155_s14 = int_to_ptr.hbm [resolvable:$true] %s154_s14 }
  0x46   : > { %s647_s28 = sshra.s32 %s155_s14, 4  ;;  %s648_s28 = int_to_ptr.hbm [resolvable:$true] %s647_s28 }
  0x47   : > { %s649_s30 = scalar_lea.hbm %s648_s28, 8  ;;  %p652_p9 = scmp.lt.s32.totalorder %s648_s28, %s1258_s2 }
  0x48   : > { %p650_p6 = scmp.ne.s32.totalorder %s648_s28, %s649_s30  ;;  %p653_p13 = scmp.lt.s32.totalorder %s1091_s18, %s649_s30 }
  0x4a   : > { %p654_p0 = por %p653_p13, %p652_p9 }
  0x4c   : > { %p655_p1 = pnand %p654_p0, %p650_p6 }
  0x4e   : > { %658 = shalt.err (!%p655_p1)  }
  0x4f   : > { %s929_s27 = smov 128   ;;  %s1287_s16 = sld [smem:[#allocation37_spill]] }
  0x50   : > { %s930_s29 = smov 1   ;;  %s526_s13 = sshll.u32 %s164_s3, 6 }
  0x51   : > { %s181_s15 = sshrl.u32 %s1079_s26, 3  ;;  %s167_s12 = sadd.s32 %s526_s13, %s165_s17 }
  0x52   : > { %s182_s19 = sand.u32 7, %s1079_s26   ;;  %s168_s20 = scalar_lea.hbm %s1258_s2, %s167_s12 }
  0x53   : > { %s527_s24 = sshll.u32 %s181_s15, 6  ;;  %s171_s23 = sshll.u32 %s168_s20, 4  ;;  %s172_s23 = int_to_ptr.hbm [resolvable:$true] %s171_s23 }
  0x54   : > { %s184_s22 = sadd.s32 %s527_s24, %s182_s19  ;;  %s671_s21 = sshra.s32 %s172_s23, 4  ;;  %s672_s21 = int_to_ptr.hbm [resolvable:$true] %s671_s21 }
  0x55   : > { %s1288_s9 = int_to_ptr.vmem [resolvable:$true] %s1287_s16  ;;  %s185_s6 = scalar_lea.hbm %s1258_s2, %s184_s22 }
  0x56   : > { %161 = dma.hbm_to_vmem [thread:$0]  %s155_s14, 128, %s1288_s9, [#allocation3], %s929_s27, %s929_s27, %s930_s29 }
  0x57   : > { %s673_s14 = scalar_lea.hbm %s672_s21, 8  ;;  %p676_p4 = scmp.lt.s32.totalorder %s672_s21, %s1258_s2 }
  0x58   : > { %p674_p3 = scmp.ne.s32.totalorder %s672_s21, %s673_s14  ;;  %p677_p7 = scmp.lt.s32.totalorder %s1091_s18, %s673_s14 }
  0x5a   : > { %p678_p5 = por %p677_p7, %p676_p4 }
  0x5c   : > { %p679_p8 = pnand %p678_p5, %p674_p3 }
  0x5e   : > { %682 = shalt.err (!%p679_p8)  }
  0x5f   : > { %s1289_s26 = sld [smem:[#allocation38_spill]]  ;;  %s188_s22 = sshll.u32 %s185_s6, 4  ;;  %s189_s22 = int_to_ptr.hbm [resolvable:$true] %s188_s22 }
  0x60   : > { %s196_s0 = sadd.s32 3, %s1066_s11  ;;  %s695_s25 = sshra.s32 %s189_s22, 4  ;;  %s696_s25 = int_to_ptr.hbm [resolvable:$true] %s695_s25 }
  0x61   : > { %s697_s21 = scalar_lea.hbm %s696_s25, 8  ;;  %p700_p2 = scmp.lt.s32.totalorder %s696_s25, %s1258_s2 }
  0x62   : > { %p698_p10 = scmp.ne.s32.totalorder %s696_s25, %s697_s21  ;;  %p701_p6 = scmp.lt.s32.totalorder %s1091_s18, %s697_s21 }
  0x64   : > { %p702_p9 = por %p701_p6, %p700_p2 }
  0x65   : > { %s1290_s17 = int_to_ptr.vmem [resolvable:$true] %s1289_s26 }
  0x66   : > { %178 = dma.hbm_to_vmem [thread:$0]  %s172_s23, 128, %s1290_s17, [#allocation3 + $0x1], %s929_s27, %s929_s27, %s930_s29 }
  0x67   : > { %p703_p13 = pnand %p702_p9, %p698_p10 }
  0x69   : > { %706 = shalt.err (!%p703_p13)  }
  0x6a   : > { %195 = dma.hbm_to_vmem [thread:$0]  %s189_s22, 128, %s191_s8, [#allocation3 + $0x2], %s929_s27, %s929_s27, %s930_s29 }
  0x6b   : > { %s197_s23 = sld [smem:[#allocation5 + %s196_s0]]  ;;  %s931_s6 = smov [#allocation2 + $0x3]  }
  0x6c   : > { %s1128_s15 = sshll.u32 %s931_s6, 4  ;;  %s213_s12 = sadd.s32 4, %s1066_s11  ;;  %s208_s15 = int_to_ptr.vmem [resolvable:$true] %s1128_s15 }
  0x6d   : > { %s214_s19 = sld [smem:[#allocation5 + %s213_s12]]  ;;  %s230_s28 = sadd.s32 5, %s1066_s11 }
  0x6e   : > { %s932_s30 = smov [#allocation2 + $0x4]   ;;  %s1135_s24 = sld [smem:[#allocation5 + %s230_s28]] }
  0x6f   : > { %s1133_s20 = sshll.u32 %s932_s30, 4  ;;  %s933_s8 = smov [#allocation2 + $0x5]   ;;  %s225_s20 = int_to_ptr.vmem [resolvable:$true] %s1133_s20 }
  0x70   : > { %s1138_s26 = sshll.u32 %s933_s8, 4  ;;  %s242_s26 = int_to_ptr.vmem [resolvable:$true] %s1138_s26 }
  0x71   : > { %s198_s14 = sshrl.u32 %s197_s23, 3  ;;  %s199_s3 = sand.u32 7, %s197_s23  }
  0x72   : > { %s528_s16 = sshll.u32 %s198_s14, 6 }
  0x73   : > { %s201_s17 = sadd.s32 %s528_s16, %s199_s3  ;;  %s215_s22 = sshrl.u32 %s214_s19, 3 }
  0x74   : > { %s202_s21 = scalar_lea.hbm %s1258_s2, %s201_s17  ;;  %s216_s9 = sand.u32 7, %s214_s19  }
  0x75   : > { %s205_s13 = sshll.u32 %s202_s21, 4  ;;  %s529_s6 = sshll.u32 %s215_s22, 6  ;;  %s206_s13 = int_to_ptr.hbm [resolvable:$true] %s205_s13 }
  0x76   : > { %s218_s12 = sadd.s32 %s529_s6, %s216_s9  ;;  %s719_s28 = sshra.s32 %s206_s13, 4  ;;  %s720_s28 = int_to_ptr.hbm [resolvable:$true] %s719_s28 }
  0x77   : > { %s721_s30 = scalar_lea.hbm %s720_s28, 8  ;;  %p724_p1 = scmp.lt.s32.totalorder %s720_s28, %s1258_s2 }
  0x78   : > { %p722_p0 = scmp.ne.s32.totalorder %s720_s28, %s721_s30  ;;  %p725_p3 = scmp.lt.s32.totalorder %s1091_s18, %s721_s30 }
  0x7a   : > { %p726_p4 = por %p725_p3, %p724_p1 }
  0x7c   : > { %p727_p7 = pnand %p726_p4, %p722_p0 }
  0x7e   : > { %730 = shalt.err (!%p727_p7)  }
  0x7f   : > { %212 = dma.hbm_to_vmem [thread:$0]  %s206_s13, 128, %s208_s15, [#allocation3 + $0x3], %s929_s27, %s929_s27, %s930_s29 }
  0x80   : > { %s219_s16 = scalar_lea.hbm %s1258_s2, %s218_s12  ;;  %s232_s8 = sshrl.u32 %s1135_s24, 3 }
  0x81   : > { %s222_s17 = sshll.u32 %s219_s16, 4  ;;  %s233_s22 = sand.u32 7, %s1135_s24   ;;  %s223_s17 = int_to_ptr.hbm [resolvable:$true] %s222_s17 }
  0x82   : > { %s530_s0 = sshll.u32 %s232_s8, 6  ;;  %s743_s25 = sshra.s32 %s223_s17, 4  ;;  %s744_s25 = int_to_ptr.hbm [resolvable:$true] %s743_s25 }
  0x83   : > { %s745_s21 = scalar_lea.hbm %s744_s25, 8  ;;  %p748_p8 = scmp.lt.s32.totalorder %s744_s25, %s1258_s2 }
  0x84   : > { %p746_p5 = scmp.ne.s32.totalorder %s744_s25, %s745_s21  ;;  %p749_p10 = scmp.lt.s32.totalorder %s1091_s18, %s745_s21 }
  0x86   : > { %p750_p2 = por %p749_p10, %p748_p8 }
  0x88   : > { %p751_p6 = pnand %p750_p2, %p746_p5 }
  0x8a   : > { %754 = shalt.err (!%p751_p6)  }
  0x8b   : > { %229 = dma.hbm_to_vmem [thread:$0]  %s223_s17, 128, %s225_s20, [#allocation3 + $0x4], %s929_s27, %s929_s27, %s930_s29 }
  0x8c   : > { %s235_s15 = sadd.s32 %s530_s0, %s233_s22  ;;  %s247_s28 = sadd.s32 6, %s1066_s11 }
  0x8d   : > { %s236_s12 = scalar_lea.hbm %s1258_s2, %s235_s15  ;;  %s248_s23 = sld [smem:[#allocation5 + %s247_s28]] }
  0x8e   : > { %s239_s30 = sshll.u32 %s236_s12, 4  ;;  %s240_s30 = int_to_ptr.hbm [resolvable:$true] %s239_s30 }
  0x8f   : > { %s767_s14 = sshra.s32 %s240_s30, 4  ;;  %s768_s14 = int_to_ptr.hbm [resolvable:$true] %s767_s14 }
  0x90   : > { %s769_s19 = scalar_lea.hbm %s768_s14, 8  ;;  %p772_p13 = scmp.lt.s32.totalorder %s768_s14, %s1258_s2 }
  0x91   : > { %p770_p9 = scmp.ne.s32.totalorder %s768_s14, %s769_s19  ;;  %p773_p0 = scmp.lt.s32.totalorder %s1091_s18, %s769_s19 }
  0x93   : > { %p774_p1 = por %p773_p0, %p772_p13 }
  0x95   : > { %p775_p3 = pnand %p774_p1, %p770_p9 }
  0x97   : > { %778 = shalt.err (!%p775_p3)  }
  0x98   : > { %246 = dma.hbm_to_vmem [thread:$0]  %s240_s30, 128, %s242_s26, [#allocation3 + $0x5], %s929_s27, %s929_s27, %s930_s29 }
  0x99   : > { %s264_s20 = sadd.s32 7, %s1066_s11  ;;  %s934_s17 = smov [#allocation2 + $0x6]  }
  0x9a   : > { %s265_s8 = sld [smem:[#allocation5 + %s264_s20]]  ;;  %s258_s22 = sshll.u32 %s934_s17, 4  ;;  %s259_s22 = int_to_ptr.vmem [resolvable:$true] %s258_s22 }
  0x9b   : > { %s249_s0 = sshrl.u32 %s248_s23, 3  ;;  %s250_s25 = sand.u32 7, %s248_s23  }
  0x9c   : > { %s531_s21 = sshll.u32 %s249_s0, 6  ;;  %s935_s13 = smov [#allocation2 + $0x7]  }
  0x9d   : > { %s252_s9 = sadd.s32 %s531_s21, %s250_s25  ;;  %s1182_s12 = sshll.u32 %s935_s13, 4  ;;  %s276_s12 = int_to_ptr.vmem [resolvable:$true] %s1182_s12 }
  0x9e   : > { %s253_s24 = scalar_lea.hbm %s1258_s2, %s252_s9 }
  0x9f   : > { %s256_s28 = sshll.u32 %s253_s24, 4  ;;  %s257_s28 = int_to_ptr.hbm [resolvable:$true] %s256_s28 }
  0xa0   : > { %s266_s14 = sshrl.u32 %s265_s8, 3  ;;  %s267_s11 = sand.u32 7, %s265_s8  }
  0xa1   : > { %s791_s26 = sshra.s32 %s257_s28, 4  ;;  %s792_s26 = int_to_ptr.hbm [resolvable:$true] %s791_s26 }
  0xa2   : > { %s793_s30 = scalar_lea.hbm %s792_s26, 8  ;;  %p796_p7 = scmp.lt.s32.totalorder %s792_s26, %s1258_s2 }
  0xa3   : > { %p794_p4 = scmp.ne.s32.totalorder %s792_s26, %s793_s30  ;;  %p797_p5 = scmp.lt.s32.totalorder %s1091_s18, %s793_s30 }
  0xa5   : > { %p798_p8 = por %p797_p5, %p796_p7 }
  0xa7   : > { %p799_p10 = pnand %p798_p8, %p794_p4 }
  0xa9   : > { %802 = shalt.err (!%p799_p10)  }
  0xaa   : > { %263 = dma.hbm_to_vmem [thread:$0]  %s257_s28, 128, %s259_s22, [#allocation3 + $0x6], %s929_s27, %s929_s27, %s930_s29 }
  0xab   : > { %s532_s3 = sshll.u32 %s266_s14, 6 }
  0xac   : > { %s269_s16 = sadd.s32 %s532_s3, %s267_s11 }
  0xad   : > { %s270_s17 = scalar_lea.hbm %s1258_s2, %s269_s16 }
  0xae   : > { %s273_s0 = sshll.u32 %s270_s17, 4  ;;  %s274_s0 = int_to_ptr.hbm [resolvable:$true] %s273_s0 }
  0xaf   : > { %s815_s25 = sshra.s32 %s274_s0, 4  ;;  %s816_s25 = int_to_ptr.hbm [resolvable:$true] %s815_s25 }
  0xb0   : > { %s817_s21 = scalar_lea.hbm %s816_s25, 8  ;;  %p820_p6 = scmp.lt.s32.totalorder %s816_s25, %s1258_s2 }
  0xb1   : > { %p818_p2 = scmp.ne.s32.totalorder %s816_s25, %s817_s21  ;;  %p821_p9 = scmp.lt.s32.totalorder %s1091_s18, %s817_s21 }
  0xb3   : > { %p822_p13 = por %p821_p9, %p820_p6 }
  0xb5   : > { %p823_p0 = pnand %p822_p13, %p818_p2 }
  0xb7   : > { %826 = shalt.err (!%p823_p0)  }
  0xb8   : > { %280 = dma.hbm_to_vmem [thread:$0]  %s274_s0, 128, %s276_s12, [#allocation3 + $0x7], %s929_s27, %s929_s27, %s930_s29 }
  0xb9   : > { %s1291_s22 = sshll.u32 %s1053_s7, 6 }
  0xba   : > { %s1204_s15 = scalar_lea.vmem [#allocation10], %s1291_s22 }
  0xbb   : > { %889 = dma.done.wait [#allocation3], 128 }
  0xbc   : > { %890 = vsyncadd [#allocation3], 4294967168 }
  0xbd   : > { %891 = dma.done.wait [#allocation3 + $0x1], 128 }
  0xbe   : > { %892 = vsyncadd [#allocation3 + $0x1], 4294967168 }
  0xbf   : > { %893 = dma.done.wait [#allocation3 + $0x2], 128 }
  0xc0   : > { %894 = vsyncadd [#allocation3 + $0x2], 4294967168 }
  0xc1   : > { %895 = dma.done.wait [#allocation3 + $0x3], 128 }
  0xc2   : > { %896 = vsyncadd [#allocation3 + $0x3], 4294967168 }
  0xc3   : > { %897 = dma.done.wait [#allocation3 + $0x4], 128 }
  0xc4   : > { %898 = vsyncadd [#allocation3 + $0x4], 4294967168 }
  0xc5   : > { %899 = dma.done.wait [#allocation3 + $0x5], 128 }
  0xc6   : > { %900 = vsyncadd [#allocation3 + $0x5], 4294967168 }
  0xc7   : > { %901 = dma.done.wait [#allocation3 + $0x6], 128 }
  0xc8   : > { %902 = vsyncadd [#allocation3 + $0x6], 4294967168 }
  0xc9   : > { %903 = dma.done.wait [#allocation3 + $0x7], 128 }
  0xca   : > { %904 = vsyncadd [#allocation3 + $0x7], 4294967168  ;;  %s297_s18 = sld [smem:[#allocation6]]  ;;  %v298_v0 = vld [vmem:[%s1059_s10] sm:$0xff]  ;;  %v299_v3 = vld [vmem:[%s1059_s10 + $0x8] sm:$0xff]  ;;  %s547_s29 = sshll.u32 %s988_s1, 6 }
  0xcb   : > { %v316_v2 = vld [vmem:[#allocation2] sm:$0xff]  ;;  %v317_v6 = vld [vmem:[#allocation2 + $0x8] sm:$0xff]  ;;  %v300_v7 = vld [vmem:[%s1059_s10 + $0x10] sm:$0xff]  ;;  %s361_s13 = scalar_lea.hbm %s1260_s4, %s547_s29  ;;  %s350_s28 = scalar_lea.sflag [#allocation9], %s1053_s7 }
  0xcc   : > { %v318_v8 = vld [vmem:[#allocation2 + $0x10] sm:$0xff]  ;;  %v301_v11 = vld [vmem:[%s1059_s10 + $0x18] sm:$0xff]  ;;  %v302_v13 = vld [vmem:[%s1059_s10 + $0x20] sm:$0xff]  ;;  %s365_s12 = sshll.u32 %s361_s13, 4  ;;  %s859_s23 = scalar_lea.hbm %s1260_s4, 128  ;;  %s366_s12 = int_to_ptr.hbm [resolvable:$true] %s365_s12 }
  0xcd   : > { %v319_v12 = vld [vmem:[#allocation2 + $0x18] sm:$0xff]  ;;  %v320_v18 = vld [vmem:[#allocation2 + $0x20] sm:$0xff]  ;;  %v303_v19 = vld [vmem:[%s1059_s10 + $0x28] sm:$0xff]  ;;  %s853_s14 = sshra.s32 %s366_s12, 4  ;;  %s854_s14 = int_to_ptr.hbm [resolvable:$true] %s853_s14 }
  0xce   : > { %v321_v20 = vld [vmem:[#allocation2 + $0x28] sm:$0xff]  ;;  %v304_v25 = vld [vmem:[%s1059_s10 + $0x30] sm:$0xff]  ;;  %v305_v27 = vld [vmem:[%s1059_s10 + $0x38] sm:$0xff]  ;;  %s363_s10 = sshll.u32 %s1204_s15, 4  ;;  %s855_s11 = scalar_lea.hbm %s854_s14, 64  ;;  %s364_s10 = int_to_ptr.vmem [resolvable:$true] %s363_s10 }
  0xcf   : > { %v322_v26 = vld [vmem:[#allocation2 + $0x30] sm:$0xff]  ;;  %v323_v32 = vld [vmem:[#allocation2 + $0x38] sm:$0xff]  ;;  %p856_p1 = scmp.ne.s32.totalorder %s854_s14, %s855_s11  ;;  %p860_p7 = scmp.lt.s32.totalorder %s854_s14, %s1260_s4 }
  0xd0   : > { %v306_v1 = vstv %s297_s18  ;;  %s315_s27 = ssub.f32 1.0, %s297_s18  ;;  %p861_p5 = scmp.lt.s32.totalorder %s859_s23, %s855_s11 }
  0xd1   : > { %v307_v4 = vmul.f32 %v306_v1, %v298_v0  ;;  %v308_v5 = vmul.f32 %v306_v1, %v299_v3  ;;  %v309_v10 = vmul.f32 %v306_v1, %v300_v7  ;;  %v310_v17 = vmul.f32 %v306_v1, %v301_v11  ;;  %p857_p3 = pnand %p856_p1, %p1017_p11 }
  0xd2   : > { %v324_v9 = vstv %s315_s27  ;;  %v311_v22 = vmul.f32 %v306_v1, %v302_v13  ;;  %v312_v24 = vmul.f32 %v306_v1, %v303_v19  ;;  %v313_v34 = vmul.f32 %v306_v1, %v304_v25  ;;  %p862_p8 = por %p861_p5, %p860_p7 }
  0xd3   : > { %v325_v14 = vmul.f32 %v324_v9, %v316_v2  ;;  %v326_v15 = vmul.f32 %v324_v9, %v317_v6  ;;  %v327_v16 = vmul.f32 %v324_v9, %v318_v8  ;;  %v328_v21 = vmul.f32 %v324_v9, %v319_v12  ;;  %p858_p4 = pneg %p857_p3 }
  0xd4   : > { %v329_v23 = vmul.f32 %v324_v9, %v320_v18  ;;  %v330_v31 = vmul.f32 %v324_v9, %v321_v20  ;;  %v331_v35 = vmul.f32 %v324_v9, %v322_v26  ;;  %v314_v37 = vmul.f32 %v306_v1, %v305_v27 }
  0xd5   : > { %v333_v28 = vadd.f32 %v325_v14, %v307_v4  ;;  %v334_v29 = vadd.f32 %v326_v15, %v308_v5  ;;  %v335_v30 = vadd.f32 %v327_v16, %v309_v10  ;;  %v336_v33 = vadd.f32 %v328_v21, %v310_v17  ;;  %p863_p10 = pnand %p862_p8, %p858_p4 }
  0xd6   : > { %v337_v36 = vadd.f32 %v329_v23, %v311_v22  ;;  %v332_v38 = vmul.f32 %v324_v9, %v323_v32  ;;  %v338_v39 = vadd.f32 %v330_v31, %v312_v24  ;;  %v339_v40 = vadd.f32 %v331_v35, %v313_v34 }
  0xd7   : > { %341 = vst [vmem:[%s1204_s15] sm:$0xff] %v333_v28 }
  0xd8   : > { %342 = vst [vmem:[%s1204_s15 + $0x8] sm:$0xff] %v334_v29  ;;  %v340_v41 = vadd.f32 %v332_v38, %v314_v37 }
  0xd9   : > { %343 = vst [vmem:[%s1204_s15 + $0x10] sm:$0xff] %v335_v30 }
  0xda   : > { %344 = vst [vmem:[%s1204_s15 + $0x18] sm:$0xff] %v336_v33 }
  0xdb   : > { %345 = vst [vmem:[%s1204_s15 + $0x20] sm:$0xff] %v337_v36 }
  0xdc   : > { %346 = vst [vmem:[%s1204_s15 + $0x28] sm:$0xff] %v338_v39 }
  0xdd   : > { %347 = vst [vmem:[%s1204_s15 + $0x30] sm:$0xff] %v339_v40 }
  0xde   : > { %348 = vst [vmem:[%s1204_s15 + $0x38] sm:$0xff] %v340_v41 }
  0xdf   : > { %866 = shalt.err (!%p863_p10)
}
  0xe0   : > { %550 = dma.vmem_to_hbm [thread:$0]  (%p1017_p11), %s364_s10, 1024, %s366_s12, %s350_s28  }
  0xe1 PF: > { %s1292_s7 = sld [smem:[#allocation30_spill]] }
  0xe2   : > { %s1294_s20 = sld [smem:[#allocation33_spill]] }
  0xe7   : > { %s377_s8 = sand.u32 1, %s1292_s7  }
  0xe8   : > { %p1295_p2 = scmp.ge.s32.totalorder %s1294_s20, 2  ;;  %s378_s17 = scalar_lea.sflag [#allocation9], %s377_s8 }
  0xea   : > { %p557_p6 = pnand %p1295_p2, %p1021_p12 }
  0xec   : > { %p558_p9 = pneg %p557_p6 }
  0xee   : > { %906 = dma.done.wait (%p558_p9), %s378_s17, 1024  }
  0xef   : > { %908 = vsyncadd (%p558_p9), %s378_s17, 4294966272  ;;  %s1296_s0 = sld [smem:[#allocation34_spill]] }
  0xf0   : > { %s1297_s21 = sld [smem:[#allocation31_spill]] }
  0xf1   : > { %s1298_s22 = sld [smem:[#allocation32_spill]] }
  0xf2   : > { %s1299_s23 = sld [smem:[#allocation35_spill]] }
  0xf5   : > { %p26_p13 = scmp.ge.s32.totalorder %s1296_s0, 4  }
  0xf7   :  { %28 = sbr.rel (!%p26_p13) target bundleno = 12 (0xc), region = 98 }
  0xfc   :  { %384 = vsyncpa [#allocation8], 1 }
  0xfd   :  { %386 = vsyncpa [#allocation8 + $0x1], 1 }
  0xfe   :  { %387 = vsyncpa [#allocation9], 1 }
  0xff   :  { %389 = vsyncpa [#allocation9 + $0x1], 1 }
 0x100   :  { %390 = vsyncmov [#allocation3] }
 0x103   :  { %s391_s5 = vpop.sfrf %390 }
 0x104   :  { %p538_p11 = scmp.ne.s32.totalorder %s391_s5, 0 }
 0x106   :  { %395 = shalt.err (%p538_p11)  }
 0x107   :  { %397 = vsyncmov [#allocation3 + $0x1] }
 0x10a   :  { %s398_s25 = vpop.sfrf %397 }
 0x10b   :  { %p539_p12 = scmp.ne.s32.totalorder %s398_s25, 0 }
 0x10d   :  { %402 = shalt.err (%p539_p12)  }
 0x10e   :  { %404 = vsyncmov [#allocation3 + $0x2] }
 0x111   :  { %s405_s9 = vpop.sfrf %404 }
 0x112   :  { %p540_p0 = scmp.ne.s32.totalorder %s405_s9, 0 }
 0x114   :  { %409 = shalt.err (%p540_p0)  }
 0x115   :  { %411 = vsyncmov [#allocation3 + $0x3] }
 0x118   :  { %s412_s6 = vpop.sfrf %411 }
 0x119   :  { %p541_p1 = scmp.ne.s32.totalorder %s412_s6, 0 }
 0x11b   :  { %416 = shalt.err (%p541_p1)  }
 0x11c   :  { %418 = vsyncmov [#allocation3 + $0x4] }
 0x11f   :  { %s419_s2 = vpop.sfrf %418 }
 0x120   :  { %p542_p3 = scmp.ne.s32.totalorder %s419_s2, 0 }
 0x122   :  { %423 = shalt.err (%p542_p3)  }
 0x123   :  { %425 = vsyncmov [#allocation3 + $0x5] }
 0x126   :  { %s426_s4 = vpop.sfrf %425 }
 0x127   :  { %p543_p4 = scmp.ne.s32.totalorder %s426_s4, 0 }
 0x129   :  { %430 = shalt.err (%p543_p4)  }
 0x12a   :  { %432 = vsyncmov [#allocation3 + $0x6] }
 0x12d   :  { %s433_s0 = vpop.sfrf %432 }
 0x12e   :  { %p544_p7 = scmp.ne.s32.totalorder %s433_s0, 0 }
 0x130   :  { %437 = shalt.err (%p544_p7)  }
 0x131   :  { %439 = vsyncmov [#allocation3 + $0x7] }
 0x134   :  { %s440_s21 = vpop.sfrf %439 }
 0x135   :  { %p545_p5 = scmp.ne.s32.totalorder %s440_s21, 0 }
 0x137   :  { %444 = shalt.err (%p545_p5)  }

</bundles_post_ra>
